<compile_context>
chip_gen: v5e
topology: v5e:2x2
jax: 0.10.0
libtpu: 0.0.40
codegen_flags: <defaults>
</compile_context>

<pallas_src>
import functools

import jax
import jax.numpy as jnp
from jax.experimental import pallas as pl
from jax.experimental.pallas import tpu as pltpu

_EPSILON = float(jnp.finfo(jnp.float32).tiny)   # matches np.finfo(np.float32).tiny


def _make_kernel(k, tau, hard):
    inv_tau = 1.0 / float(tau)

    def kernel(s_ref, o_ref):
        scores = s_ref[...].astype(jnp.float32)            # (tR, C)
        khot = jnp.zeros_like(scores)
        onehot = jnp.zeros_like(scores)

        # k is a small static Python int: the loop unrolls and every iteration stays
        # resident (no HBM round-trips between iterations).
        for _ in range(k):
            khot_mask = jnp.maximum(1.0 - onehot, _EPSILON)
            scores = scores + jnp.log(khot_mask)
            logits = scores * inv_tau
            m = jnp.max(logits, axis=-1, keepdims=True)
            e = jnp.exp(logits - m)
            denom = jnp.sum(e, axis=-1, keepdims=True)
            onehot = e / denom
            khot = khot + onehot

        if hard:
            # Row-wise iterative arg-top-k (first-index tie break) -> 0/1 scatter mask.
            col = jax.lax.broadcasted_iota(jnp.int32, khot.shape, 1)
            ncols = khot.shape[-1]
            remaining = khot
            khot_hard = jnp.zeros_like(khot)
            for _ in range(k):
                row_max = jnp.max(remaining, axis=-1, keepdims=True)
                is_max = remaining == row_max
                sel = jnp.min(jnp.where(is_max, col, ncols), axis=-1, keepdims=True)
                pick = col == sel
                khot_hard = khot_hard + pick.astype(jnp.float32)
                remaining = jnp.where(pick, -jnp.inf, remaining)
            # Straight-through forward value: khot_hard - khot.detach() + khot.
            # TODO(synk): gradient rerouting (detach trick) needs a jax.custom_vjp
            # around the call; only the forward value is produced here.
            out = khot_hard - khot + khot
        else:
            out = khot

        o_ref[...] = out.astype(o_ref.dtype)

    return kernel


@functools.partial(jax.jit, static_argnames=("k", "tau", "hard", "block_rows"))
def _subset_operator_call(scores, k, tau, hard, block_rows):
    n, c = scores.shape
    tr = min(block_rows, n)                     # row tile; C (softmax axis) stays whole
    grid = (pl.cdiv(n, tr),)
    kernel = _make_kernel(k, tau, hard)
    itemsize = jnp.dtype(scores.dtype).itemsize
    cost = pl.CostEstimate(
        flops=int(8 * k * n * c),
        transcendentals=int(2 * k * n * c),     # exp + log per element per iteration
        bytes_accessed=int(2 * n * c * itemsize),
    )
    return pl.pallas_call(
        kernel,
        out_shape=jax.ShapeDtypeStruct((n, c), scores.dtype),
        grid_spec=pltpu.PrefetchScalarGridSpec(
            num_scalar_prefetch=0,
            grid=grid,
            in_specs=[pl.BlockSpec((tr, c), lambda i: (i, 0))],
            out_specs=pl.BlockSpec((tr, c), lambda i: (i, 0)),
        ),
        compiler_params=pltpu.CompilerParams(
            dimension_semantics=("parallel",)),
        cost_estimate=cost,
    )(scores)


def subset_operator(scores, k, tau=1.0, hard=False, training=False, rng_key=None,
                    block_rows=256):
    """Pallas forward of SubsetOperator. scores: [N, C]; relaxed k-hot over axis 1."""
    assert scores.ndim == 2
    if training:
        # Gumbel perturbation of the module's training path (stateless JAX key).
        if rng_key is None:
            raise ValueError("training=True requires rng_key for Gumbel noise")
        scores = scores + jax.random.gumbel(rng_key, scores.shape, dtype=scores.dtype)
    return _subset_operator_call(scores, int(k), float(tau), bool(hard), int(block_rows))


def _reference(scores, k, tau=1.0, hard=False):
    # Pure-JAX reference mirroring the PyTorch forward (eval mode) exactly.
    khot = jnp.zeros_like(scores)
    onehot = jnp.zeros_like(scores)
    s = scores
    for _ in range(k):
        khot_mask = jnp.maximum(1.0 - onehot, _EPSILON)
        s = s + jnp.log(khot_mask)
        onehot = jax.nn.softmax(s / tau, axis=1)
        khot = khot + onehot
    if hard:
        _, ind = jax.lax.top_k(khot, k)
        rows = jnp.arange(khot.shape[0])[:, None]
        khot_hard = jnp.zeros_like(khot).at[rows, ind].set(1.0)
        return khot_hard - jax.lax.stop_gradient(khot) + khot
    return khot


if __name__ == "__main__":
    N, C, K = 8, 32, 4
    key = jax.random.PRNGKey(0)
    scores = jax.random.normal(key, (N, C), dtype=jnp.float32)

    out_soft = jax.block_until_ready(subset_operator(scores, k=K, tau=1.0, hard=False))
    ref_soft = _reference(scores, K, tau=1.0, hard=False)
    assert out_soft.shape == (N, C)
    assert jnp.allclose(out_soft, ref_soft, atol=1e-5, rtol=1e-5)

    out_hard = jax.block_until_ready(subset_operator(scores, k=K, tau=1.0, hard=True))
    ref_hard = _reference(scores, K, tau=1.0, hard=True)
    assert jnp.allclose(out_hard, ref_hard, atol=1e-5, rtol=1e-5)

    print("KERNEL_OK")
</pallas_src>

<mosaic_0001>
module attributes {stable_mosaic.version = 11 : i64} {
  func.func @kernel(%arg0: i32, %arg1: memref<8x32xf32, #tpu.memory_space<vmem>>, %arg2: memref<8x32xf32, #tpu.memory_space<vmem>>) attributes {dimension_semantics = [#tpu.dimension_semantics<parallel>], iteration_bounds = array<i64: 1>, scalar_prefetch = 0 : i64, scratch_operands = 0 : i64, tpu.core_type = #tpu.core_type<tc>, window_params = [{transform_indices = @transform_0, window_bounds = array<i64: 8, 32>}, {transform_indices = @transform_1, window_bounds = array<i64: 8, 32>}]} {
    %c0 = arith.constant 0 : index
    %c0_0 = arith.constant 0 : index
    %0 = vector.load %arg1[%c0, %c0_0] : memref<8x32xf32, #tpu.memory_space<vmem>>, vector<8x32xf32>
    %cst = arith.constant 0.000000e+00 : f32
    %1 = vector.broadcast %cst : f32 to vector<8x32xf32>
    %cst_1 = arith.constant 0.000000e+00 : f32
    %2 = vector.broadcast %cst_1 : f32 to vector<8x32xf32>
    %cst_2 = arith.constant 1.000000e+00 : f32
    %3 = vector.broadcast %cst_2 : f32 to vector<8x32xf32>
    %4 = arith.subf %3, %2 : vector<8x32xf32>
    %cst_3 = arith.constant 1.17549435E-38 : f32
    %5 = vector.broadcast %cst_3 : f32 to vector<8x32xf32>
    %6 = arith.maximumf %4, %5 : vector<8x32xf32>
    %7 = math.log %6 : vector<8x32xf32>
    %8 = arith.addf %0, %7 : vector<8x32xf32>
    %cst_4 = arith.constant 1.000000e+00 : f32
    %9 = vector.broadcast %cst_4 : f32 to vector<8x32xf32>
    %10 = arith.mulf %8, %9 : vector<8x32xf32>
    %cst_5 = arith.constant dense<0xFF800000> : vector<8xf32>
    %11 = vector.multi_reduction <maximumf>, %10, %cst_5 [1] : vector<8x32xf32> to vector<8xf32>
    %12 = vector.shape_cast %11 : vector<8xf32> to vector<8x1xf32>
    %13 = vector.broadcast %12 : vector<8x1xf32> to vector<8x32xf32>
    %14 = arith.subf %10, %13 : vector<8x32xf32>
    %15 = math.exp %14 : vector<8x32xf32>
    %cst_6 = arith.constant dense<0.000000e+00> : vector<8xf32>
    %16 = vector.multi_reduction <add>, %15, %cst_6 [1] : vector<8x32xf32> to vector<8xf32>
    %17 = vector.shape_cast %16 : vector<8xf32> to vector<8x1xf32>
    %18 = vector.broadcast %17 : vector<8x1xf32> to vector<8x32xf32>
    %19 = arith.divf %15, %18 : vector<8x32xf32>
    %20 = arith.addf %1, %19 : vector<8x32xf32>
    %cst_7 = arith.constant 1.000000e+00 : f32
    %21 = vector.broadcast %cst_7 : f32 to vector<8x32xf32>
    %22 = arith.subf %21, %19 : vector<8x32xf32>
    %cst_8 = arith.constant 1.17549435E-38 : f32
    %23 = vector.broadcast %cst_8 : f32 to vector<8x32xf32>
    %24 = arith.maximumf %22, %23 : vector<8x32xf32>
    %25 = math.log %24 : vector<8x32xf32>
    %26 = arith.addf %8, %25 : vector<8x32xf32>
    %cst_9 = arith.constant 1.000000e+00 : f32
    %27 = vector.broadcast %cst_9 : f32 to vector<8x32xf32>
    %28 = arith.mulf %26, %27 : vector<8x32xf32>
    %cst_10 = arith.constant dense<0xFF800000> : vector<8xf32>
    %29 = vector.multi_reduction <maximumf>, %28, %cst_10 [1] : vector<8x32xf32> to vector<8xf32>
    %30 = vector.shape_cast %29 : vector<8xf32> to vector<8x1xf32>
    %31 = vector.broadcast %30 : vector<8x1xf32> to vector<8x32xf32>
    %32 = arith.subf %28, %31 : vector<8x32xf32>
    %33 = math.exp %32 : vector<8x32xf32>
    %cst_11 = arith.constant dense<0.000000e+00> : vector<8xf32>
    %34 = vector.multi_reduction <add>, %33, %cst_11 [1] : vector<8x32xf32> to vector<8xf32>
    %35 = vector.shape_cast %34 : vector<8xf32> to vector<8x1xf32>
    %36 = vector.broadcast %35 : vector<8x1xf32> to vector<8x32xf32>
    %37 = arith.divf %33, %36 : vector<8x32xf32>
    %38 = arith.addf %20, %37 : vector<8x32xf32>
    %cst_12 = arith.constant 1.000000e+00 : f32
    %39 = vector.broadcast %cst_12 : f32 to vector<8x32xf32>
    %40 = arith.subf %39, %37 : vector<8x32xf32>
    %cst_13 = arith.constant 1.17549435E-38 : f32
    %41 = vector.broadcast %cst_13 : f32 to vector<8x32xf32>
    %42 = arith.maximumf %40, %41 : vector<8x32xf32>
    %43 = math.log %42 : vector<8x32xf32>
    %44 = arith.addf %26, %43 : vector<8x32xf32>
    %cst_14 = arith.constant 1.000000e+00 : f32
    %45 = vector.broadcast %cst_14 : f32 to vector<8x32xf32>
    %46 = arith.mulf %44, %45 : vector<8x32xf32>
    %cst_15 = arith.constant dense<0xFF800000> : vector<8xf32>
    %47 = vector.multi_reduction <maximumf>, %46, %cst_15 [1] : vector<8x32xf32> to vector<8xf32>
    %48 = vector.shape_cast %47 : vector<8xf32> to vector<8x1xf32>
    %49 = vector.broadcast %48 : vector<8x1xf32> to vector<8x32xf32>
    %50 = arith.subf %46, %49 : vector<8x32xf32>
    %51 = math.exp %50 : vector<8x32xf32>
    %cst_16 = arith.constant dense<0.000000e+00> : vector<8xf32>
    %52 = vector.multi_reduction <add>, %51, %cst_16 [1] : vector<8x32xf32> to vector<8xf32>
    %53 = vector.shape_cast %52 : vector<8xf32> to vector<8x1xf32>
    %54 = vector.broadcast %53 : vector<8x1xf32> to vector<8x32xf32>
    %55 = arith.divf %51, %54 : vector<8x32xf32>
    %56 = arith.addf %38, %55 : vector<8x32xf32>
    %cst_17 = arith.constant 1.000000e+00 : f32
    %57 = vector.broadcast %cst_17 : f32 to vector<8x32xf32>
    %58 = arith.subf %57, %55 : vector<8x32xf32>
    %cst_18 = arith.constant 1.17549435E-38 : f32
    %59 = vector.broadcast %cst_18 : f32 to vector<8x32xf32>
    %60 = arith.maximumf %58, %59 : vector<8x32xf32>
    %61 = math.log %60 : vector<8x32xf32>
    %62 = arith.addf %44, %61 : vector<8x32xf32>
    %cst_19 = arith.constant 1.000000e+00 : f32
    %63 = vector.broadcast %cst_19 : f32 to vector<8x32xf32>
    %64 = arith.mulf %62, %63 : vector<8x32xf32>
    %cst_20 = arith.constant dense<0xFF800000> : vector<8xf32>
    %65 = vector.multi_reduction <maximumf>, %64, %cst_20 [1] : vector<8x32xf32> to vector<8xf32>
    %66 = vector.shape_cast %65 : vector<8xf32> to vector<8x1xf32>
    %67 = vector.broadcast %66 : vector<8x1xf32> to vector<8x32xf32>
    %68 = arith.subf %64, %67 : vector<8x32xf32>
    %69 = math.exp %68 : vector<8x32xf32>
    %cst_21 = arith.constant dense<0.000000e+00> : vector<8xf32>
    %70 = vector.multi_reduction <add>, %69, %cst_21 [1] : vector<8x32xf32> to vector<8xf32>
    %71 = vector.shape_cast %70 : vector<8xf32> to vector<8x1xf32>
    %72 = vector.broadcast %71 : vector<8x1xf32> to vector<8x32xf32>
    %73 = arith.divf %69, %72 : vector<8x32xf32>
    %74 = arith.addf %56, %73 : vector<8x32xf32>
    %c0_22 = arith.constant 0 : index
    %c0_23 = arith.constant 0 : index
    %75 = vector.load %arg2[%c0_22, %c0_23] : memref<8x32xf32, #tpu.memory_space<vmem>>, vector<8x32xf32>
    tpu.vector_store %arg2[%c0_22, %c0_23], %74 {strides = array<i32>} : memref<8x32xf32, #tpu.memory_space<vmem>>, vector<8x32xf32>,
    return
  }
  func.func @transform_0(%arg0: i32) -> (i32, i32) {
    %c0_i32 = arith.constant 0 : i32
    %c0_i32_0 = arith.constant 0 : i32
    return %arg0, %c0_i32 : i32, i32
  }
  func.func @transform_1(%arg0: i32) -> (i32, i32) {
    %c0_i32 = arith.constant 0 : i32
    %c0_i32_0 = arith.constant 0 : i32
    return %arg0, %c0_i32 : i32, i32
  }
}

</mosaic_0001>

<bundles_post_ra>
// kernel: _subset_operator_call.1
= control target key start
LH: loop header
LB: loop body
LE: loop exit
PB: predicated region body
PF: predicated region fallthrough
CT: control target
= control target key end

     0   :  { %6 = vsyncpa [#allocation3], 0  ;;  %s266_s0 = inlined_call_operand.hbm [shape: f32[8,32], index: 0, kind: input, shape index: {}]   ;;  %s267_s1 = inlined_call_operand.hbm [shape: f32[8,32], index: 1, kind: output, shape index: {}]  }
   0x1   :  { %7 = vsyncpa [#allocation4], 0  ;;  %s13_s8 = sshll.u32 %s266_s0, 4  ;;  %s235_s9 = smov [#allocation2]   ;;  %s14_s8 = int_to_ptr.hbm [resolvable:$true] %s13_s8 }
   0x2   :  { %s15_s10 = sshll.u32 %s235_s9, 4  ;;  %s16_s10 = int_to_ptr.vmem [resolvable:$true] %s15_s10 }
   0x3   :  { %18 = dma.hbm_to_vmem [thread:$0]  %s14_s8, 128, %s16_s10, [#allocation3]  }
   0x4   :  { %231 = dma.done.wait [#allocation3], 128  }
   0x5   :  { %232 = vsyncadd [#allocation3], 4294967168  ;;  %vm25_vm0 = vcmask 261120   ;;  %v23_v0 = vld [vmem:[#allocation2] sm:$0xff]  ;;  %s236_s0 = smov [#allocation5]   ;;  %s149_s14 = sshll.u32 %s267_s1, 4  ;;  %s150_s14 = int_to_ptr.hbm [resolvable:$true] %s149_s14 }
   0x6   :  { %v26_v1 = vsel %vm25_vm0, %v23_v0, -inf  ;;  %s147_s11 = sshll.u32 %s236_s0, 4  ;;  %s148_s11 = int_to_ptr.vmem [resolvable:$true] %s147_s11 }
   0x7   :  { %27 = vmax.xlane.f32.xlu0 %v26_v1 }
  0x7a   :  { %v28_v2 = vpop.xlane.xlu0 %27 }
  0x7b   :  { %v29_v3 = vsub.f32 %v23_v0, %v28_v2 }
  0x7d   :  { %v30_v4 = vmul.f32 1.442695, %v29_v3 }
  0x7f   :  { %161 = vpow2.f32 %v30_v4 }
  0x85   :  { %v162_v5 = vpop.eup %161 }
  0x86   :  { %v32_v6 = vsel %vm25_vm0, %v162_v5, 0.0 }
  0x87   :  { %33 = vadd.xlane.f32.xlu0 %v32_v6 }
  0xfa   :  { %v34_v7 = vpop.xlane.xlu0 %33 }
  0xfb   :  { %163 = vrcp.f32 %v34_v7  ;;  %v46_v11 = vand.u32 2147483648, %v34_v7  ;;  %v44_v13 = vand.u32 2147483647, %v34_v7  ;;  %vm40_vm2 = vweird.f32 %v34_v7 }
  0xfd   :  { %v47_v15 = vor.u32 1.1754944e-38, %v46_v11  ;;  %vm45_vm4 = vcmp.eq.f32.partialorder %v44_v13, 8.507059e+37 }
 0x101   :  { %v164_v8 = vpop.eup %163 }
 0x102   :  { %v36_v9 = vmul.f32 %v164_v8, %v34_v7  ;;  %vm41_vm1 = vweird.f32 %v164_v8 }
 0x103   :  { %vm42_vm3 = vmor %vm40_vm2, %vm41_vm1 }
 0x104   :  { %v37_v10 = vsub.f32 1.0, %v36_v9 }
 0x106   :  { %v38_v12 = vmul.f32 %v164_v8, %v37_v10 }
 0x108   :  { %v39_v14 = vadd.f32 %v164_v8, %v38_v12 }
 0x10a   :  { %v43_v16 = vsel %vm42_vm3, %v164_v8, %v39_v14 }
 0x10b   :  { %v48_v17 = vsel %vm45_vm4, %v47_v15, %v43_v16 }
 0x10c   :  { %v252_v18 = vmul.f32 %v162_v5, %v48_v17 }
 0x10e   :  { %v51_v19 = vsub.f32 1.0, %v252_v18 }
 0x110   :  { %v52_v20 = vmax.f32 %v51_v19, 1.1754944e-38 }
 0x112   :  { %165 = vlog2.f32 %v52_v20 }
 0x118   :  { %v166_v21 = vpop.eup %165 }
 0x119   :  { %v54_v22 = vmul.f32 0.6931472, %v166_v21 }
 0x11b   :  { %v55_v23 = vadd.f32 %v54_v22, %v23_v0 }
 0x11d   :  { %v56_v24 = vsel %vm25_vm0, %v55_v23, -inf }
 0x11e   :  { %57 = vmax.xlane.f32.xlu1 %v56_v24 }
 0x191   :  { %v58_v25 = vpop.xlane.xlu1 %57 }
 0x192   :  { %v59_v26 = vsub.f32 %v55_v23, %v58_v25 }
 0x194   :  { %v60_v27 = vmul.f32 1.442695, %v59_v26 }
 0x196   :  { %167 = vpow2.f32 %v60_v27 }
 0x19c   :  { %v168_v28 = vpop.eup %167 }
 0x19d   :  { %v62_v29 = vsel %vm25_vm0, %v168_v28, 0.0 }
 0x19e   :  { %63 = vadd.xlane.f32.xlu1 %v62_v29 }
 0x211   :  { %v64_v30 = vpop.xlane.xlu1 %63 }
 0x212   :  { %169 = vrcp.f32 %v64_v30  ;;  %v76_v34 = vand.u32 2147483648, %v64_v30  ;;  %v74_v36 = vand.u32 2147483647, %v64_v30  ;;  %vm70_vm6 = vweird.f32 %v64_v30 }
 0x214   :  { %v77_v38 = vor.u32 1.1754944e-38, %v76_v34  ;;  %vm75_vm8 = vcmp.eq.f32.partialorder %v74_v36, 8.507059e+37 }
 0x218   :  { %v170_v31 = vpop.eup %169 }
 0x219   :  { %v66_v32 = vmul.f32 %v170_v31, %v64_v30  ;;  %vm71_vm5 = vweird.f32 %v170_v31 }
 0x21a   :  { %vm72_vm7 = vmor %vm70_vm6, %vm71_vm5 }
 0x21b   :  { %v67_v33 = vsub.f32 1.0, %v66_v32 }
 0x21d   :  { %v68_v35 = vmul.f32 %v170_v31, %v67_v33 }
 0x21f   :  { %v69_v37 = vadd.f32 %v170_v31, %v68_v35 }
 0x221   :  { %v73_v39 = vsel %vm72_vm7, %v170_v31, %v69_v37 }
 0x222   :  { %v78_v40 = vsel %vm75_vm8, %v77_v38, %v73_v39 }
 0x223   :  { %v79_v41 = vmul.f32 %v168_v28, %v78_v40 }
 0x225   :  { %v81_v42 = vsub.f32 1.0, %v79_v41  ;;  %v80_v1 = vadd.f32 %v79_v41, %v252_v18 }
 0x227   :  { %v82_v43 = vmax.f32 %v81_v42, 1.1754944e-38 }
 0x229   :  { %171 = vlog2.f32 %v82_v43 }
 0x22f   :  { %v172_v44 = vpop.eup %171 }
 0x230   :  { %v84_v45 = vmul.f32 0.6931472, %v172_v44 }
 0x232   :  { %v85_v46 = vadd.f32 %v84_v45, %v55_v23 }
 0x234   :  { %v86_v47 = vsel %vm25_vm0, %v85_v46, -inf }
 0x235   :  { %87 = vmax.xlane.f32.xlu2 %v86_v47 }
 0x2a8   :  { %v88_v48 = vpop.xlane.xlu2 %87 }
 0x2a9   :  { %v89_v49 = vsub.f32 %v85_v46, %v88_v48 }
 0x2ab   :  { %v90_v50 = vmul.f32 1.442695, %v89_v49 }
 0x2ad   :  { %173 = vpow2.f32 %v90_v50 }
 0x2b3   :  { %v174_v51 = vpop.eup %173 }
 0x2b4   :  { %v92_v52 = vsel %vm25_vm0, %v174_v51, 0.0 }
 0x2b5   :  { %93 = vadd.xlane.f32.xlu2 %v92_v52 }
 0x328   :  { %v94_v53 = vpop.xlane.xlu2 %93 }
 0x329   :  { %175 = vrcp.f32 %v94_v53  ;;  %v106_v57 = vand.u32 2147483648, %v94_v53  ;;  %v104_v59 = vand.u32 2147483647, %v94_v53  ;;  %vm100_vm10 = vweird.f32 %v94_v53 }
 0x32b   :  { %v107_v61 = vor.u32 1.1754944e-38, %v106_v57  ;;  %vm105_vm12 = vcmp.eq.f32.partialorder %v104_v59, 8.507059e+37 }
 0x32f   :  { %v176_v54 = vpop.eup %175 }
 0x330   :  { %v96_v55 = vmul.f32 %v176_v54, %v94_v53  ;;  %vm101_vm9 = vweird.f32 %v176_v54 }
 0x331   :  { %vm102_vm11 = vmor %vm100_vm10, %vm101_vm9 }
 0x332   :  { %v97_v56 = vsub.f32 1.0, %v96_v55 }
 0x334   :  { %v98_v58 = vmul.f32 %v176_v54, %v97_v56 }
 0x336   :  { %v99_v60 = vadd.f32 %v176_v54, %v98_v58 }
 0x338   :  { %v103_v62 = vsel %vm102_vm11, %v176_v54, %v99_v60 }
 0x339   :  { %v108_v63 = vsel %vm105_vm12, %v107_v61, %v103_v62 }
 0x33a   :  { %v109_v0 = vmul.f32 %v174_v51, %v108_v63 }
 0x33c   :  { %v111_v2 = vsub.f32 1.0, %v109_v0  ;;  %v110_v3 = vadd.f32 %v109_v0, %v80_v1 }
 0x33e   :  { %v112_v4 = vmax.f32 %v111_v2, 1.1754944e-38 }
 0x340   :  { %177 = vlog2.f32 %v112_v4 }
 0x346   :  { %v178_v5 = vpop.eup %177 }
 0x347   :  { %v114_v6 = vmul.f32 0.6931472, %v178_v5 }
 0x349   :  { %v115_v7 = vadd.f32 %v114_v6, %v85_v46 }
 0x34b   :  { %v116_v8 = vsel %vm25_vm0, %v115_v7, -inf }
 0x34c   :  { %117 = vmax.xlane.f32.xlu0 %v116_v8 }
 0x3bf   :  { %v118_v9 = vpop.xlane.xlu0 %117 }
 0x3c0   :  { %v119_v10 = vsub.f32 %v115_v7, %v118_v9 }
 0x3c2   :  { %v120_v11 = vmul.f32 1.442695, %v119_v10 }
 0x3c4   :  { %179 = vpow2.f32 %v120_v11 }
 0x3ca   :  { %v180_v12 = vpop.eup %179 }
 0x3cb   :  { %v122_v13 = vsel %vm25_vm0, %v180_v12, 0.0 }
 0x3cc   :  { %123 = vadd.xlane.f32.xlu1 %v122_v13 }
 0x43f   :  { %v124_v14 = vpop.xlane.xlu1 %123 }
 0x440   :  { %181 = vrcp.f32 %v124_v14  ;;  %v136_v18 = vand.u32 2147483648, %v124_v14  ;;  %v134_v20 = vand.u32 2147483647, %v124_v14  ;;  %vm130_vm14 = vweird.f32 %v124_v14 }
 0x442   :  { %v137_v22 = vor.u32 1.1754944e-38, %v136_v18  ;;  %vm135_vm1 = vcmp.eq.f32.partialorder %v134_v20, 8.507059e+37 }
 0x446   :  { %v182_v15 = vpop.eup %181 }
 0x447   :  { %v126_v16 = vmul.f32 %v182_v15, %v124_v14  ;;  %vm131_vm13 = vweird.f32 %v182_v15 }
 0x448   :  { %vm132_vm15 = vmor %vm130_vm14, %vm131_vm13 }
 0x449   :  { %v127_v17 = vsub.f32 1.0, %v126_v16 }
 0x44b   :  { %v128_v19 = vmul.f32 %v182_v15, %v127_v17 }
 0x44d   :  { %v129_v21 = vadd.f32 %v182_v15, %v128_v19 }
 0x44f   :  { %v133_v23 = vsel %vm132_vm15, %v182_v15, %v129_v21 }
 0x450   :  { %v138_v24 = vsel %vm135_vm1, %v137_v22, %v133_v23 }
 0x451   :  { %v139_v25 = vmul.f32 %v180_v12, %v138_v24 }
 0x453   :  { %v140_v26 = vadd.f32 %v139_v25, %v110_v3 }
 0x455   :  { %141 = vst.msk [vmem:[#allocation5] sm:$0xff] %vm25_vm0, %v140_v26 }
 0x456   :  { %152 = dma.vmem_to_hbm [thread:$0]  %s148_s11, 128, %s150_s14, [#allocation4]  }
 0x457   :  { %233 = dma.done.wait [#allocation4], 128  }
 0x458   :  { %234 = vsyncadd [#allocation4], 4294967168 }
 0x459   :  { %157 = vsyncpa [#allocation3], 1 }
 0x45a   :  { %158 = vsyncpa [#allocation4], 1 }

</bundles_post_ra>
